<compile_context>
chip_gen: v7x
topology: tpu7x:2x2x1
jax: 0.10.0
libtpu: 0.0.40
codegen_flags: <defaults>
</compile_context>

<pallas_src>
import functools
import math

import jax
import jax.numpy as jnp
from jax import lax
from jax.experimental import pallas as pl
from jax.experimental.pallas import tpu as pltpu


def _round_up(a, b):
    return ((a + b - 1) // b) * b


def _cparams(dims):
    return pltpu.CompilerParams(dimension_semantics=dims,
                                vmem_limit_bytes=64 * 1024 * 1024)


# ---------------------------------------------------------------------------
# Kernel A: fused QKV projection -> lane-dense [N, H*D] q / k / v
# ---------------------------------------------------------------------------
def _qkv_kernel(x_ref, w_ref, b_ref, q_ref, k_ref, v_ref, *, hd):
    x = x_ref[...].astype(jnp.bfloat16)
    w = w_ref[...].astype(jnp.bfloat16)
    y = jnp.dot(x, w, preferred_element_type=jnp.float32) + b_ref[...]
    q_ref[...] = y[:, :hd]
    k_ref[...] = y[:, hd:2 * hd]
    v_ref[...] = y[:, 2 * hd:]


def qkv_pallas(x, w_qkv, b_qkv, hd, tile_n):
    n_pad, cin = x.shape
    out = jax.ShapeDtypeStruct((n_pad, hd), jnp.float32)
    kern = functools.partial(_qkv_kernel, hd=hd)
    return pl.pallas_call(
        kern,
        out_shape=(out, out, out),
        grid=(n_pad // tile_n,),
        in_specs=[
            pl.BlockSpec((tile_n, cin), lambda t: (t, 0)),
            pl.BlockSpec((cin, 3 * hd), lambda t: (0, 0)),
            pl.BlockSpec((1, 3 * hd), lambda t: (0, 0)),
        ],
        out_specs=(
            pl.BlockSpec((tile_n, hd), lambda t: (t, 0)),
            pl.BlockSpec((tile_n, hd), lambda t: (t, 0)),
            pl.BlockSpec((tile_n, hd), lambda t: (t, 0)),
        ),
        compiler_params=_cparams(("parallel",)),
    )(x, w_qkv, b_qkv)


# ---------------------------------------------------------------------------
# Kernel B: per-head key statistics over a packed proj1|proj lane block.
#   pass 0: exact per-head global key max (two-pass, reference numerics)
#   pass 1: accumulate kvs=[D,Mp], sum_n k'/k1' (one combined lane vector),
#           and emit k1' edge features (bf16, M1 lanes only).
# ---------------------------------------------------------------------------
def _kv_state_kernel(k_ref, v_ref, pj_ref, kvs_ref, ks_ref, kp1_ref,
                     kmx_sc, kmx1_sc,
                     *, n_valid, tile_n, m, m1, num_heads, head_dim, sigma, eps):
    p = pl.program_id(0)
    t = pl.program_id(1)
    d = head_dim
    mtot_p = pj_ref.shape[-1]
    dn = 1.0 / (float(d) ** 0.25)
    sigma2 = sigma * sigma
    ratio = 1.0 / (float(m) ** 0.5)
    ratio1 = 1.0 / (float(m1) ** 0.5)

    lane = lax.broadcasted_iota(jnp.int32, (1, mtot_p), 1)
    lmask1 = lane < m1                          # proj1 lanes [0, m1)
    lmask = (lane >= m1) & (lane < m1 + m)      # proj  lanes [m1, m1+m)
    rows = t * tile_n + lax.broadcasted_iota(jnp.int32, (tile_n, 1), 0)
    rmask = rows < n_valid
    neg = jnp.float32(-jnp.inf)

    pj_bf = pj_ref[...].astype(jnp.bfloat16)

    @pl.when(p == 0)                 # pass 0: per-head global key max
    def _():
        @pl.when(t == 0)
        def _():
            kmx_sc[...] = jnp.full(kmx_sc.shape, -jnp.inf, jnp.float32)
            kmx1_sc[...] = jnp.full(kmx1_sc.shape, -jnp.inf, jnp.float32)
        for h in range(num_heads):                       # static unroll (H small)
            kn = k_ref[:, h * d:(h + 1) * d] * dn
            d_all = jnp.dot(kn.astype(jnp.bfloat16), pj_bf,
                            preferred_element_type=jnp.float32)      # [T, Mp]
            mvals = jnp.where(rmask & lmask, d_all, neg)
            mvals1 = jnp.where(rmask & lmask1, d_all, neg)
            tmax = jnp.max(jnp.max(mvals, axis=-1, keepdims=True),
                           axis=0, keepdims=True)
            tmax1 = jnp.max(jnp.max(mvals1, axis=-1, keepdims=True),
                            axis=0, keepdims=True)
            kmx_sc[h, :, :] = jnp.maximum(kmx_sc[h, :, :], tmax)
            kmx1_sc[h, :, :] = jnp.maximum(kmx1_sc[h, :, :], tmax1)

    @pl.when(p == 1)                 # pass 1: accumulate + emit k1'
    def _():
        @pl.when(t == 0)
        def _():
            kvs_ref[...] = jnp.zeros_like(kvs_ref)
            ks_ref[...] = jnp.zeros_like(ks_ref)
        lane_ratio = jnp.where(lmask1, ratio1, jnp.where(lmask, ratio, 0.0))
        for h in range(num_heads):
            kn = k_ref[:, h * d:(h + 1) * d] * dn
            vh = v_ref[:, h * d:(h + 1) * d]
            diag_k = jnp.sum(kn * kn, axis=-1, keepdims=True) * (0.5 * sigma2)
            d_all = jnp.dot(kn.astype(jnp.bfloat16), pj_bf,
                            preferred_element_type=jnp.float32)
            sub = jnp.where(lmask1, kmx1_sc[h, :, :], kmx_sc[h, :, :])  # per-lane max
            kp_all = jnp.where(rmask,
                               lane_ratio * (jnp.exp(d_all - diag_k - sub) + eps),
                               0.0)                                      # [T, Mp]
            # kvs in lane-dense [D, Mp] layout (contract over the N rows)
            kvs_ref[h, :, :] += lax.dot_general(
                vh.astype(jnp.bfloat16), kp_all.astype(jnp.bfloat16),
                (((0,), (0,)), ((), ())), preferred_element_type=jnp.float32)
            ks_ref[h, :, :] += jnp.sum(kp_all, axis=0, keepdims=True)
            # k1' edge features: only the M1 real lanes, bf16
            kp1_ref[h, :, :] = kp_all[:, :m1].astype(jnp.bfloat16)


def kv_state_pallas(k_arr, v_arr, proj_packed, n_valid, m, m1,
                    num_heads, head_dim, tile_n, sigma, eps):
    n_pad, hd = k_arr.shape
    d = head_dim
    mtot_p = proj_packed.shape[1]
    nt = n_pad // tile_n
    kern = functools.partial(_kv_state_kernel, n_valid=n_valid, tile_n=tile_n,
                             m=m, m1=m1, num_heads=num_heads, head_dim=d,
                             sigma=sigma, eps=eps)
    return pl.pallas_call(
        kern,
        out_shape=(
            jax.ShapeDtypeStruct((num_heads, d, mtot_p), jnp.float32),   # kvs
            jax.ShapeDtypeStruct((num_heads, 1, mtot_p), jnp.float32),   # sum_n k'|k1'
            jax.ShapeDtypeStruct((num_heads, n_pad, m1), jnp.bfloat16),  # k1' (edges)
        ),
        grid=(2, nt),
        in_specs=[
            pl.BlockSpec((tile_n, hd), lambda p, t: (t, 0)),
            pl.BlockSpec((tile_n, hd), lambda p, t: (t * p, 0)),  # v only read in pass 1
            pl.BlockSpec((d, mtot_p), lambda p, t: (0, 0)),
        ],
        out_specs=(
            pl.BlockSpec((num_heads, d, mtot_p), lambda p, t: (0, 0, 0)),
            pl.BlockSpec((num_heads, 1, mtot_p), lambda p, t: (0, 0, 0)),
            pl.BlockSpec((num_heads, tile_n, m1), lambda p, t: (0, t * p, 0)),
        ),
        scratch_shapes=[pltpu.VMEM((num_heads, 1, 1), jnp.float32),
                        pltpu.VMEM((num_heads, 1, 1), jnp.float32)],
        compiler_params=_cparams(("arbitrary", "arbitrary")),
    )(k_arr, v_arr, proj_packed)


# ---------------------------------------------------------------------------
# Kernel C: attention output with Wo fused in the epilogue + normalized q1'
#           edge features (bf16, M1 lanes).  No K input (kp1 comes from kernel B).
# ---------------------------------------------------------------------------
def _attn_edge_kernel(q_ref, pj_ref, kvs_ref, ks_ref, wo_ref, bo_ref,
                      z_ref, qp1_ref,
                      *, m, m1, num_heads, head_dim, sigma, eps):
    d = head_dim
    mtot_p = pj_ref.shape[-1]
    cout = wo_ref.shape[-1]
    tile_n = q_ref.shape[0]
    dn = 1.0 / (float(d) ** 0.25)
    sigma2 = sigma * sigma
    ratio = 1.0 / (float(m) ** 0.5)
    ratio1 = 1.0 / (float(m1) ** 0.5)

    lane = lax.broadcasted_iota(jnp.int32, (1, mtot_p), 1)
    lmask1 = lane < m1
    lmask = (lane >= m1) & (lane < m1 + m)
    neg = jnp.float32(-jnp.inf)

    pj_bf = pj_ref[...].astype(jnp.bfloat16)
    z_acc = jnp.zeros((tile_n, cout), jnp.float32)

    for h in range(num_heads):                           # static unroll (H small)
        qn = q_ref[:, h * d:(h + 1) * d] * dn
        diag_q = jnp.sum(qn * qn, axis=-1, keepdims=True) * (0.5 * sigma2)
        d_all = jnp.dot(qn.astype(jnp.bfloat16), pj_bf,
                        preferred_element_type=jnp.float32)           # [T, Mp]
        qmax = jnp.max(jnp.where(lmask, d_all, neg), axis=-1, keepdims=True)
        qmax1 = jnp.max(jnp.where(lmask1, d_all, neg), axis=-1, keepdims=True)
        base = jnp.exp(d_all - diag_q - jnp.where(lmask1, qmax1, qmax)) + eps
        qp = jnp.where(lmask, ratio * base, 0.0)         # proj lanes
        qp1 = jnp.where(lmask1, ratio1 * base, 0.0)      # proj1 lanes

        ksh = ks_ref[h, :, :]                                            # [1, Mp]
        z_num = lax.dot_general(qp.astype(jnp.bfloat16),
                                kvs_ref[h, :, :].astype(jnp.bfloat16),
                                (((1,), (1,)), ((), ())),
                                preferred_element_type=jnp.float32)      # [T, D]
        z_den = jnp.sum(qp * ksh, axis=-1, keepdims=True)
        z_h = z_num * pl.reciprocal(z_den, approx=True)
        # Wo fused: accumulate per-head contribution of the output projection
        z_acc = z_acc + jnp.dot(z_h.astype(jnp.bfloat16),
                                wo_ref[h * d:(h + 1) * d, :].astype(jnp.bfloat16),
                                preferred_element_type=jnp.float32)

        # edge q1' with the per-row normalizer folded in (EXACT recip: feeds log)
        den1 = jnp.sum(qp1 * ksh, axis=-1, keepdims=True)
        qp1_ref[h, :, :] = (qp1[:, :m1] / den1).astype(jnp.bfloat16)

    z_ref[...] = z_acc + bo_ref[...]


def attn_edge_pallas(q_arr, proj_packed, kvs, ks_all, wo, bo,
                     m, m1, num_heads, head_dim, tile_n, sigma, eps):
    n_pad, hd = q_arr.shape
    d = head_dim
    mtot_p = proj_packed.shape[1]
    cout = wo.shape[1]
    kern = functools.partial(_attn_edge_kernel, m=m, m1=m1, num_heads=num_heads,
                             head_dim=d, sigma=sigma, eps=eps)
    return pl.pallas_call(
        kern,
        out_shape=(
            jax.ShapeDtypeStruct((n_pad, cout), jnp.float32),            # Wo(z)
            jax.ShapeDtypeStruct((num_heads, n_pad, m1), jnp.bfloat16),  # q1'/normalizer
        ),
        grid=(n_pad // tile_n,),
        in_specs=[
            pl.BlockSpec((tile_n, hd), lambda t: (t, 0)),
            pl.BlockSpec((d, mtot_p), lambda t: (0, 0)),
            pl.BlockSpec((num_heads, d, mtot_p), lambda t: (0, 0, 0)),
            pl.BlockSpec((num_heads, 1, mtot_p), lambda t: (0, 0, 0)),
            pl.BlockSpec((hd, cout), lambda t: (0, 0)),
            pl.BlockSpec((1, cout), lambda t: (0, 0)),
        ],
        out_specs=(
            pl.BlockSpec((tile_n, cout), lambda t: (t, 0)),
            pl.BlockSpec((num_heads, tile_n, m1), lambda t: (0, t, 0)),
        ),
        compiler_params=_cparams(("parallel",)),
    )(q_arr, proj_packed, kvs, ks_all, wo, bo)


# ---------------------------------------------------------------------------
# Glue: parameter init, projection matrix, full forward
# ---------------------------------------------------------------------------
def init_params(key, in_channels, out_channels, num_heads):
    hd = out_channels * num_heads

    def lin(k, fan_in, fan_out):
        k1, k2 = jax.random.split(k)
        bound = 1.0 / math.sqrt(fan_in)
        w = jax.random.uniform(k1, (fan_in, fan_out), jnp.float32, -bound, bound)
        b = jax.random.uniform(k2, (fan_out,), jnp.float32, -bound, bound)
        return w, b

    ks = jax.random.split(key, 4)
    return {
        "Wq": lin(ks[0], in_channels, hd),
        "Wk": lin(ks[1], in_channels, hd),
        "Wv": lin(ks[2], in_channels, hd),
        "Wo": lin(ks[3], hd, out_channels),
    }


def create_projection_matrix_jax(key, m, d, sigma=1.0):
    """Deterministic JAX version of create_projection_matrix (QR of gaussian blocks)."""
    nb_full_blocks = m // d
    blocks = []
    for _ in range(nb_full_blocks):
        key, sub = jax.random.split(key)
        unstructured = jax.random.normal(sub, (d, d), jnp.float32) * sigma
        q, _ = jnp.linalg.qr(unstructured)
        blocks.append(q.T)
    remaining = m - nb_full_blocks * d
    if remaining > 0:
        key, sub = jax.random.split(key)
        unstructured = jax.random.normal(sub, (d, d), jnp.float32) * sigma
        q, _ = jnp.linalg.qr(unstructured)
        blocks.append(q.T[:remaining])
    final = jnp.vstack(blocks)
    key, sub = jax.random.split(key)
    multiplier = jnp.linalg.norm(jax.random.normal(sub, (m, d), jnp.float32) * sigma,
                                 axis=1)
    return multiplier[:, None] * final


def nodeformer_conv_forward(z, edge, label, params, proj, proj1,
                            tau=0.25, sigma=1.0, num_heads=2, out_channels=8,
                            eps=1e-6):
    """Eval-mode NodeFormerConv forward. z: [1, N, Cin]; edge: [2, E]; label: [E]."""
    B, N, Cin = z.shape
    H, D = num_heads, out_channels
    HD = H * D
    x = z[0]

    M, M1 = proj.shape[0], proj1.shape[0]
    MTOT_P = _round_up(M + M1, 128)
    # pack proj1 (lanes [0,M1)) and proj (lanes [M1,M1+M)) into ONE 128-lane block
    proj_packed = jnp.zeros((D, MTOT_P), jnp.float32)
    proj_packed = proj_packed.at[:, :M1].set(proj1.T)
    proj_packed = proj_packed.at[:, M1:M1 + M].set(proj.T)

    TILE_N = min(512, _round_up(N, 16))
    N_pad = _round_up(N, TILE_N)
    x_p = jnp.pad(x, ((0, N_pad - N), (0, 0)))

    # fused QKV: concat weights, fold 1/sqrt(tau) into Wq/Wk, lane-dense [N, H*D] out
    scale = 1.0 / math.sqrt(tau)
    wq, bq = params["Wq"]
    wk, bk = params["Wk"]
    wv, bv = params["Wv"]
    w_qkv = jnp.concatenate([wq * scale, wk * scale, wv], axis=1)
    b_qkv = jnp.concatenate([bq * scale, bk * scale, bv]).reshape(1, -1)
    q_arr, k_arr, v_arr = qkv_pallas(x_p, w_qkv, b_qkv, HD, TILE_N)

    # kernel B: per-head global key max + kvs / key-sum accumulators + k1' edge feats
    kvs, ks_all, kp1 = kv_state_pallas(k_arr, v_arr, proj_packed, N, M, M1,
                                       H, D, TILE_N, sigma, eps)

    # kernel C: attention output with fused Wo + normalized q1' edge features
    wo, bo = params["Wo"]
    z_next_pad, qp1n = attn_edge_pallas(q_arr, proj_packed, kvs, ks_all,
                                        wo, bo.reshape(1, -1),
                                        M, M1, H, D, TILE_N, sigma, eps)
    z_next = z_next_pad[:N][None]

    # edge attention weights: A[h,e] = sum_m q1'_norm[h, end[e], m] * k1'[h, start[e], m]
    start, end = edge[0], edge[1]
    # TODO(synk): for very large E, replace this JAX gather with a
    # PrefetchScalarGridSpec edge kernel (start/end prefetched into SMEM,
    # per-edge row gather) so the [H, E, M1] product is never materialized.
    A = jnp.sum(qp1n[:, end, :].astype(jnp.float32) *
                kp1[:, start, :].astype(jnp.float32), axis=-1)        # [H, E]
    A_weight = A.T[None]                                              # [1, E, H]

    # edge (link) loss -- masked form (jit-safe; equals torch.nonzero semantics)
    mask = (label == 1).astype(jnp.float32)
    col = edge[1]
    d_in = jnp.zeros((N,), jnp.float32).at[col].add(mask)
    d_norm = jnp.where(mask > 0, 1.0 / jnp.maximum(d_in[col], 1.0), 0.0)
    n_pos = jnp.sum(mask)
    link_loss = jnp.sum(jnp.log(A_weight[0]) * (d_norm * mask)[:, None]) / (n_pos * H)

    return z_next, link_loss, jnp.mean(A_weight, axis=-1).squeeze()


# ---------------------------------------------------------------------------
# Pure-JAX reference (mirrors the PyTorch code) for verification
# ---------------------------------------------------------------------------
def ref_forward(z, edge, label, params, proj, proj1, tau, sigma, num_heads, out_channels):
    B, N, _ = z.shape
    H, D = num_heads, out_channels

    def lin(x, wb):
        w, b = wb
        return x @ w + b

    query = lin(z, params["Wq"]).reshape(B, N, H, D)
    key = lin(z, params["Wk"]).reshape(B, N, H, D)
    value = lin(z, params["Wv"]).reshape(B, N, H, D)
    q = query / math.sqrt(tau)
    k = key / math.sqrt(tau)

    def kt(data, is_query, pm, eps=1e-6, sig=1.0):
        sigma2 = sig * sig
        dn = 1.0 / jnp.sqrt(jnp.sqrt(jnp.float32(data.shape[-1])))
        data = dn * data
        ratio = 1.0 / jnp.sqrt(jnp.float32(pm.shape[0]))
        dd = jnp.einsum("bnhd,md->bnhm", data, pm)
        diag = (jnp.sum(data * data, axis=-1) / 2.0 * sigma2)[..., None]
        if is_query:
            return ratio * (jnp.exp(dd - diag - jnp.max(dd, axis=-1, keepdims=True)) + eps)
        mx = jnp.max(jnp.max(dd, axis=-1, keepdims=True), axis=1, keepdims=True)
        return ratio * (jnp.exp(dd - diag - mx) + eps)

    qp = jnp.transpose(kt(q, True, proj, sig=sigma), (1, 0, 2, 3))
    kp = jnp.transpose(kt(k, False, proj, sig=sigma), (1, 0, 2, 3))
    vv = jnp.transpose(value, (1, 0, 2, 3))
    kvs = jnp.einsum("nbhm,nbhd->bhmd", kp, vv)
    z_num = jnp.einsum("nbhm,bhmd->nbhd", qp, kvs)
    ks_sum = jnp.einsum("nbhm->bhm", kp)
    z_den = jnp.einsum("nbhm,bhm->nbh", qp, ks_sum)
    z_output = jnp.transpose(z_num, (1, 0, 2, 3)) / jnp.transpose(z_den, (1, 0, 2))[..., None]

    qp1 = jnp.transpose(kt(q, True, proj1, sig=sigma), (1, 0, 2, 3))
    kp1 = jnp.transpose(kt(k, False, proj1, sig=sigma), (1, 0, 2, 3))
    start, end = edge[0], edge[1]
    edge_attn_num = jnp.einsum("ebhm,ebhm->ebh", qp1[end], kp1[start])
    edge_attn_num = jnp.transpose(edge_attn_num, (1, 0, 2))
    ks_sum1 = jnp.einsum("nbhm->bhm", kp1)
    attn_normalizer = jnp.einsum("nbhm,bhm->nbh", qp1, ks_sum1)
    edge_attn_dem = jnp.transpose(attn_normalizer[end], (1, 0, 2))
    A_weight = edge_attn_num / edge_attn_dem

    z_next = lin(z_output.reshape(B, N, H * D), params["Wo"])

    pos_idx = jnp.nonzero(label == 1)[0]
    edge_pos = edge[:, pos_idx]
    weight_pos = A_weight[:, pos_idx, :]
    col = edge_pos[1]
    d_in = jnp.zeros((N,), jnp.float32).at[col].add(1.0)
    d_norm = 1.0 / d_in[col]
    d_norm_ = jnp.broadcast_to(d_norm[None, :, None], weight_pos.shape)
    link_loss = jnp.mean(jnp.log(weight_pos) * d_norm_)
    return z_next, link_loss, jnp.mean(A_weight, axis=-1).squeeze()


# ---------------------------------------------------------------------------
if __name__ == "__main__":
    B, N, Cin = 1, 16, 16
    H, D = 2, 8                 # num_heads, out_channels
    M, M1 = 10, 30              # nb_random_features, second projection size
    E = 12
    tau, sigma = 0.25, 1.0

    key = jax.random.PRNGKey(0)
    k1, k2, k3, k4, k5 = jax.random.split(key, 5)
    z = jax.random.normal(k1, (B, N, Cin), jnp.float32)
    edge = jax.random.randint(k2, (2, E), 0, N)
    label = jnp.array([1, 0, 1, 1, 0, 1, 0, 0, 1, 1, 0, 1], dtype=jnp.int32)
    params = init_params(k3, Cin, D, H)
    proj = create_projection_matrix_jax(k4, M, D, sigma)
    proj1 = create_projection_matrix_jax(k5, M1, D, sigma)

    z_next, link_loss, w_mean = nodeformer_conv_forward(
        z, edge, label, params, proj, proj1, tau, sigma, H, D)
    jax.block_until_ready((z_next, link_loss, w_mean))

    # ground-truth reference in full f32 precision
    with jax.default_matmul_precision("highest"):
        z_ref, ll_ref, w_ref = ref_forward(
            z, edge, label, params, proj, proj1, tau, sigma, H, D)

    # bf16 MXU inputs / bf16 edge-feature storage / approx reciprocal on z_den
    assert jnp.allclose(z_next, z_ref, atol=5e-2, rtol=5e-2), "z_next mismatch"
    assert jnp.allclose(link_loss, ll_ref, atol=5e-2, rtol=5e-2), "link_loss mismatch"
    assert jnp.allclose(w_mean, w_ref, atol=5e-2, rtol=5e-2), "weight mismatch"

    print("KERNEL_OK")
</pallas_src>

<mosaic_0001>
module attributes {stable_mosaic.version = 11 : i64} {
  func.func @_qkv_kernel(%arg0: i32, %arg1: memref<16x16xf32, #tpu.memory_space<vmem>>, %arg2: memref<16x48xf32, #tpu.memory_space<vmem>>, %arg3: memref<1x48xf32, #tpu.memory_space<vmem>>, %arg4: memref<16x16xf32, #tpu.memory_space<vmem>>, %arg5: memref<16x16xf32, #tpu.memory_space<vmem>>, %arg6: memref<16x16xf32, #tpu.memory_space<vmem>>) attributes {dimension_semantics = [#tpu.dimension_semantics<parallel>], iteration_bounds = array<i64: 1>, scalar_prefetch = 0 : i64, scratch_operands = 0 : i64, tpu.core_type = #tpu.core_type<tc>, window_params = [{transform_indices = @transform_0, window_bounds = array<i64: 16, 16>}, {pipeline_mode = #tpu.pipeline_mode<synchronous>, transform_indices = @transform_1, window_bounds = array<i64: 16, 48>}, {pipeline_mode = #tpu.pipeline_mode<synchronous>, transform_indices = @transform_2, window_bounds = array<i64: 1, 48>}, {transform_indices = @transform_3, window_bounds = array<i64: 16, 16>}, {transform_indices = @transform_4, window_bounds = array<i64: 16, 16>}, {transform_indices = @transform_5, window_bounds = array<i64: 16, 16>}]} {
    %c0 = arith.constant 0 : index
    %c0_0 = arith.constant 0 : index
    %0 = vector.load %arg1[%c0, %c0_0] : memref<16x16xf32, #tpu.memory_space<vmem>>, vector<16x16xf32>
    %1 = arith.truncf %0 : vector<16x16xf32> to vector<16x16xbf16>
    %c0_1 = arith.constant 0 : index
    %c0_2 = arith.constant 0 : index
    %2 = vector.load %arg2[%c0_1, %c0_2] : memref<16x48xf32, #tpu.memory_space<vmem>>, vector<16x48xf32>
    %3 = arith.truncf %2 : vector<16x48xf32> to vector<16x48xbf16>
    %cst = arith.constant dense<0.000000e+00> : vector<16x48xf32>
    %4 = tpu.matmul %1, %3, %cst {dimension_numbers = #tpu.dot_dimension_numbers<[1], [0], [0], [1], [0, 0, 1, 1], [], []>} : vector<16x16xbf16>, vector<16x48xbf16>, vector<16x48xf32> -> vector<16x48xf32>
    %c0_3 = arith.constant 0 : index
    %c0_4 = arith.constant 0 : index
    %5 = vector.load %arg3[%c0_3, %c0_4] : memref<1x48xf32, #tpu.memory_space<vmem>>, vector<1x48xf32>
    %6 = vector.broadcast %5 : vector<1x48xf32> to vector<16x48xf32>
    %7 = arith.addf %4, %6 : vector<16x48xf32>
    %8 = vector.extract_strided_slice %7 {offsets = [0, 0], sizes = [16, 16], strides = [1, 1]} : vector<16x48xf32> to vector<16x16xf32>
    %c0_5 = arith.constant 0 : index
    %c0_6 = arith.constant 0 : index
    %9 = vector.load %arg4[%c0_5, %c0_6] : memref<16x16xf32, #tpu.memory_space<vmem>>, vector<16x16xf32>
    tpu.vector_store %arg4[%c0_5, %c0_6], %8 {strides = array<i32>} : memref<16x16xf32, #tpu.memory_space<vmem>>, vector<16x16xf32>,
    %10 = vector.extract_strided_slice %7 {offsets = [0, 16], sizes = [16, 16], strides = [1, 1]} : vector<16x48xf32> to vector<16x16xf32>
    %c0_7 = arith.constant 0 : index
    %c0_8 = arith.constant 0 : index
    %11 = vector.load %arg5[%c0_7, %c0_8] : memref<16x16xf32, #tpu.memory_space<vmem>>, vector<16x16xf32>
    tpu.vector_store %arg5[%c0_7, %c0_8], %10 {strides = array<i32>} : memref<16x16xf32, #tpu.memory_space<vmem>>, vector<16x16xf32>,
    %12 = vector.extract_strided_slice %7 {offsets = [0, 32], sizes = [16, 16], strides = [1, 1]} : vector<16x48xf32> to vector<16x16xf32>
    %c0_9 = arith.constant 0 : index
    %c0_10 = arith.constant 0 : index
    %13 = vector.load %arg6[%c0_9, %c0_10] : memref<16x16xf32, #tpu.memory_space<vmem>>, vector<16x16xf32>
    tpu.vector_store %arg6[%c0_9, %c0_10], %12 {strides = array<i32>} : memref<16x16xf32, #tpu.memory_space<vmem>>, vector<16x16xf32>,
    return
  }
  func.func @transform_0(%arg0: i32) -> (i32, i32) {
    %c0_i32 = arith.constant 0 : i32
    %c0_i32_0 = arith.constant 0 : i32
    return %arg0, %c0_i32 : i32, i32
  }
  func.func @transform_1(%arg0: i32) -> (i32, i32) {
    %c0_i32 = arith.constant 0 : i32
    %c0_i32_0 = arith.constant 0 : i32
    %c0_i32_1 = arith.constant 0 : i32
    return %c0_i32, %c0_i32_0 : i32, i32
  }
  func.func @transform_2(%arg0: i32) -> (i32, i32) {
    %c0_i32 = arith.constant 0 : i32
    %c0_i32_0 = arith.constant 0 : i32
    %c0_i32_1 = arith.constant 0 : i32
    return %c0_i32, %c0_i32_0 : i32, i32
  }
  func.func @transform_3(%arg0: i32) -> (i32, i32) {
    %c0_i32 = arith.constant 0 : i32
    %c0_i32_0 = arith.constant 0 : i32
    return %arg0, %c0_i32 : i32, i32
  }
  func.func @transform_4(%arg0: i32) -> (i32, i32) {
    %c0_i32 = arith.constant 0 : i32
    %c0_i32_0 = arith.constant 0 : i32
    return %arg0, %c0_i32 : i32, i32
  }
  func.func @transform_5(%arg0: i32) -> (i32, i32) {
    %c0_i32 = arith.constant 0 : i32
    %c0_i32_0 = arith.constant 0 : i32
    return %arg0, %c0_i32 : i32, i32
  }
}

</mosaic_0001>

<bundles_post_ra>
// kernel: tpu_custom_call.1
= control target key start
LH: loop header
LB: loop body
LE: loop exit
PB: predicated region body
PF: predicated region fallthrough
CT: control target
= control target key end

     0   :  { %11 = vsyncpa [#allocation3], 0  ;;  %s498_s0 = inlined_call_operand.hbm [shape: f32[16,16], index: 0, kind: input, shape index: {}]   ;;  %s499_s1 = inlined_call_operand.hbm [shape: f32[16,48], index: 1, kind: input, shape index: {}]   ;;  %s500_s2 = inlined_call_operand.hbm [shape: f32[1,48], index: 2, kind: input, shape index: {}]   ;;  %s501_s3 = inlined_call_operand.hbm [shape: f32[16,16], index: 3, kind: output, shape index: {0}]   ;;  %s502_s4 = inlined_call_operand.hbm [shape: f32[16,16], index: 4, kind: output, shape index: {1}]   ;;  %s503_s5 = inlined_call_operand.hbm [shape: f32[16,16], index: 5, kind: output, shape index: {2}]  }
   0x1   :  { %12 = vsyncpa [#allocation6], 0 }
   0x2   :  { %13 = vsyncpa [#allocation4], 0 }
   0x3   :  { %14 = vsyncpa [#allocation10], 0  ;;  %s348_s18 = smov [#allocation5]   ;;  %s349_s20 = smov [#allocation2]  }
   0x4   :  { %s32_s19 = sshll.u32 %s348_s18, 4  ;;  %s20_s21 = sshll.u32 %s349_s20, 4  ;;  %s33_s19 = int_to_ptr.vmem [resolvable:$true] %s32_s19  ;;  %s390_s21 = int_to_ptr.vmem [resolvable:$true] %s20_s21 }
   0x5   :  { %s208_s24 = scalar_lea.hbm %s499_s1, 256 }
   0x6   :  { %p209_p0 = scmp.ne.s32.totalorder %s499_s1, %s208_s24  ;;  %p212_p1 = scmp.lt.u32.totalorder %s208_s24, %s499_s1 }
   0x8   :  { %p214_p2 = pnand %p212_p1, %p209_p0 }
   0xa   :  { %217 = shalt.err (!%p214_p2)
}
   0xb   :  { %s218_s29 = scalar_lea.vmem %s33_s19, 256  ;;  %p223_p4 = scmp.lt.s32.totalorder %s33_s19, %s33_s19 }
   0xc   :  { %p219_p3 = scmp.ne.s32.totalorder %s33_s19, %s218_s29  ;;  %p224_p5 = scmp.lt.s32.totalorder %s218_s29, %s218_s29 }
   0xe   :  { %p225_p6 = por %p224_p5, %p223_p4 }
  0x10   :  { %p226_p7 = pnand %p225_p6, %p219_p3 }
  0x12   :  { %229 = shalt.err (!%p226_p7)
}
  0x13   :  { %s350_s30 = smov 128   ;;  %s351_s6 = smov 8  }
  0x14   :  { %38 = dma.hbm_to_vmem [thread:$0]  %s499_s1, 256, %s33_s19, [#allocation6], %s350_s30, %s350_s30, %s351_s6  }
  0x15   :  { %s230_s11 = scalar_lea.hbm %s498_s0, 256 }
  0x16   :  { %p231_p8 = scmp.ne.s32.totalorder %s498_s0, %s230_s11  ;;  %p234_p9 = scmp.lt.u32.totalorder %s230_s11, %s498_s0 }
  0x18   :  { %p236_p10 = pnand %p234_p9, %p231_p8 }
  0x1a   :  { %239 = shalt.err (!%p236_p10)
}
  0x1b   :  { %s240_s16 = scalar_lea.vmem %s390_s21, 256  ;;  %p245_p12 = scmp.lt.s32.totalorder %s390_s21, %s390_s21 }
  0x1c   :  { %p241_p11 = scmp.ne.s32.totalorder %s390_s21, %s240_s16  ;;  %p246_p13 = scmp.lt.s32.totalorder %s240_s16, %s240_s16 }
  0x1e   :  { %p247_p0 = por %p246_p13, %p245_p12 }
  0x20   :  { %p248_p1 = pnand %p247_p0, %p241_p11 }
  0x22   :  { %251 = shalt.err (!%p248_p1)
}
  0x23   :  { %26 = dma.hbm_to_vmem [thread:$0]  %s498_s0, 256, %s390_s21, [#allocation3], %s350_s30, %s350_s30, %s351_s6  }
  0x24   :  { %s352_s18 = smov [#allocation7]   ;;  %s252_s23 = scalar_lea.hbm %s500_s2, 16 }
  0x25   :  { %s45_s19 = sshll.u32 %s352_s18, 4  ;;  %p253_p2 = scmp.ne.s32.totalorder %s500_s2, %s252_s23  ;;  %s46_s19 = int_to_ptr.vmem [resolvable:$true] %s45_s19 }
  0x26   :  { %p256_p3 = scmp.lt.u32.totalorder %s252_s23, %s500_s2 }
  0x28   :  { %p258_p4 = pnand %p256_p3, %p253_p2 }
  0x2a   :  { %261 = shalt.err (!%p258_p4)
}
  0x2b   :  { %s262_s28 = scalar_lea.vmem %s46_s19, 16  ;;  %s266_s0 = scalar_lea.vmem %s46_s19, 32 }
  0x2c   :  { %p263_p5 = scmp.ne.s32.totalorder %s46_s19, %s262_s28  ;;  %p267_p6 = scmp.lt.s32.totalorder %s46_s19, %s46_s19 }
  0x2d   :  { %p268_p7 = scmp.lt.s32.totalorder %s266_s0, %s262_s28 }
  0x2f   :  { %p269_p8 = por %p268_p7, %p267_p6 }
  0x31   :  { %p270_p9 = pnand %p269_p8, %p263_p5 }
  0x33   :  { %273 = shalt.err (!%p270_p9)
}
  0x34   :  { %48 = dma.hbm_to_vmem [thread:$0]  %s500_s2, 16, %s46_s19, [#allocation6]  }
  0x35   :  { %340 = dma.done.wait [#allocation3], 256  }
  0x36   :  { %341 = vsyncadd [#allocation3], 4294967040 }
  0x37   :  { %342 = dma.done.wait [#allocation6], 272  }
  0x38   :  { %343 = vsyncadd [#allocation6], 4294967024  ;;  %v353_v0 = vmov 0.0   ;;  %vm354_vm0 = vmmov 0   ;;  %v62_v1 = vld [vmem:[#allocation5] sm:$0xff]  ;;  %v63_v2 = vld [vmem:[#allocation5 + $0x8] sm:$0xff] }
  0x39   :  { %190 = vmatprep.subr.bf16.mxu0 %v353_v0  ;;  %192 = vmatprep.mubr.msk.bf16.mxu0 %vm354_vm0, %v353_v0  ;;  %v59_v3 = vld [vmem:[#allocation2] sm:$0xff]  ;;  %v64_v4 = vpack.c.bf16 %v63_v2, %v62_v1  ;;  %v60_v5 = vld [vmem:[#allocation2 + $0x8] sm:$0xff]  ;;  %vm72_vm1 = vcmask 130048   ;;  %s355_s2 = smov [#allocation8]   ;;  %s356_s8 = smov 96  }
  0x3a   :  { %v61_v6 = vpack.c.bf16 %v60_v5, %v59_v3  ;;  %v186_v7 = vld [vmem:[#allocation7] ss:$0 sm:$0xff]  ;;  %s142_s7 = sshll.u32 %s355_s2, 4  ;;  %s357_s9 = smov 112   ;;  %s143_s7 = int_to_ptr.vmem [resolvable:$true] %s142_s7 }
  0x3b   :  { %191 = vmatpush3.bf16.msra.mxu0 %v64_v4  ;;  %s274_s10 = scalar_lea.vmem %s143_s7, 256  ;;  %p279_p11 = scmp.lt.s32.totalorder %s143_s7, %s143_s7 }
  0x3c   :  { %p275_p10 = scmp.ne.s32.totalorder %s143_s7, %s274_s10  ;;  %p280_p12 = scmp.lt.s32.totalorder %s274_s10, %s274_s10 }
  0x3e   :  { %193 = vmatmul.mubr.msk.bf16.vlgmr.msra.gmra.mrb[0].mxu0 %vm72_vm1, %v61_v6  ;;  %p281_p13 = por %p280_p12, %p279_p11 }
  0x40   :  { %p282_p0 = pnand %p281_p13, %p275_p10 }
 0x111   :  { %v110_v8 = vpop.f32.mrb[0].mxu0 }
 0x112   :  { %v111_v9 = vadd.f32 %v186_v7, %v110_v8  ;;  %v194_v10 = vpop.f32.mrb[1].mxu0 }
 0x113   :  { %v113_v11 = vpop.f32.mrb[2].mxu0 }
 0x114   :  { %117 = vst.msk [vmem:[#allocation8] sm:$0xff] %vm72_vm1, %v111_v9  ;;  %v114_v12 = vadd.f32 %v186_v7, %v113_v11  ;;  %129 = vrot.lane.b32.xlu1 %v111_v9, %s356_s8  ;;  %121 = vrot.lane.b32.xlu0 %v111_v9, %s357_s9  ;;  %v195_v13 = vpop.f32.mrb[3].mxu0 }
 0x116   :  { %118 = vst.msk [vmem:[#allocation8 + $0x8] sm:$0xff] %vm72_vm1, %v114_v12 }
 0x117   :  { %285 = shalt.err (!%p282_p0)
}
 0x118   :  { %s286_s13 = scalar_lea.hbm %s501_s3, 256 }
 0x119   :  { %p287_p1 = scmp.ne.s32.totalorder %s501_s3, %s286_s13  ;;  %p290_p2 = scmp.lt.u32.totalorder %s286_s13, %s501_s3 }
 0x11b   :  { %p292_p3 = pnand %p290_p2, %p287_p1 }
 0x11d   :  { %295 = shalt.err (!%p292_p3)
}
 0x11e   :  { %148 = dma.vmem_to_hbm [thread:$0]  %s143_s7, 256, %s501_s3, [#allocation4], %s350_s30, %s350_s30, %s351_s6  }
 0x11f   :  { %131 = vrot.lane.b32.xlu1 %v114_v12, %s356_s8  ;;  %123 = vrot.lane.b32.xlu0 %v114_v12, %s357_s9  ;;  %s358_s19 = smov [#allocation9]   ;;  %s359_s22 = smov [#allocation11]  }
 0x120   :  { %s154_s20 = sshll.u32 %s358_s19, 4  ;;  %s166_s23 = sshll.u32 %s359_s22, 4  ;;  %s155_s20 = int_to_ptr.vmem [resolvable:$true] %s154_s20  ;;  %s459_s23 = int_to_ptr.vmem [resolvable:$true] %s166_s23 }
 0x121   :  { %s296_s3 = scalar_lea.vmem %s155_s20, 256  ;;  %p301_p5 = scmp.lt.s32.totalorder %s155_s20, %s155_s20 }
 0x122   :  { %p297_p4 = scmp.ne.s32.totalorder %s155_s20, %s296_s3  ;;  %p302_p6 = scmp.lt.s32.totalorder %s296_s3, %s296_s3 }
 0x124   :  { %p303_p7 = por %p302_p6, %p301_p5 }
 0x126   :  { %p304_p8 = pnand %p303_p7, %p297_p4 }
 0x186   :  { %v130_v14 = vpop.permute.xlu1 %129  ;;  %v122_v15 = vpop.permute.xlu0 %121 }
 0x187   :  { %135 = vst.msk [vmem:[#allocation11] sm:$0xff] %vm72_vm1, %v130_v14  ;;  %127 = vst.msk [vmem:[#allocation9] sm:$0xff] %vm72_vm1, %v122_v15 }
 0x191   :  { %v132_v16 = vpop.permute.xlu1 %131  ;;  %v124_v17 = vpop.permute.xlu0 %123 }
 0x192   :  { %136 = vst.msk [vmem:[#allocation11 + $0x8] sm:$0xff] %vm72_vm1, %v132_v16  ;;  %128 = vst.msk [vmem:[#allocation9 + $0x8] sm:$0xff] %vm72_vm1, %v124_v17 }
 0x193   :  { %307 = shalt.err (!%p304_p8)
}
 0x194   :  { %s308_s26 = scalar_lea.hbm %s502_s4, 256 }
 0x195   :  { %p309_p9 = scmp.ne.s32.totalorder %s502_s4, %s308_s26  ;;  %p312_p10 = scmp.lt.u32.totalorder %s308_s26, %s502_s4 }
 0x197   :  { %p314_p11 = pnand %p312_p10, %p309_p9 }
 0x199   :  { %317 = shalt.err (!%p314_p11)
}
 0x19a   :  { %160 = dma.vmem_to_hbm [thread:$0]  %s155_s20, 256, %s502_s4, [#allocation10], %s350_s30, %s350_s30, %s351_s6  }
 0x19b   :  { %s318_s7 = scalar_lea.vmem %s459_s23, 256  ;;  %p323_p13 = scmp.lt.s32.totalorder %s459_s23, %s459_s23 }
 0x19c   :  { %p319_p12 = scmp.ne.s32.totalorder %s459_s23, %s318_s7  ;;  %p324_p0 = scmp.lt.s32.totalorder %s318_s7, %s318_s7 }
 0x19e   :  { %p325_p1 = por %p324_p0, %p323_p13 }
 0x1a0   :  { %p326_p2 = pnand %p325_p1, %p319_p12 }
 0x1a2   :  { %329 = shalt.err (!%p326_p2)
}
 0x1a3   :  { %s330_s10 = scalar_lea.hbm %s503_s5, 256 }
 0x1a4   :  { %p331_p3 = scmp.ne.s32.totalorder %s503_s5, %s330_s10  ;;  %p334_p4 = scmp.lt.u32.totalorder %s330_s10, %s503_s5 }
 0x1a6   :  { %p336_p5 = pnand %p334_p4, %p331_p3 }
 0x1a8   :  { %339 = shalt.err (!%p336_p5)
}
 0x1a9   :  { %172 = dma.vmem_to_hbm [thread:$0]  %s459_s23, 256, %s503_s5, [#allocation10], %s350_s30, %s350_s30, %s351_s6  }
 0x1aa   :  { %344 = dma.done.wait [#allocation4], 256  }
 0x1ab   :  { %345 = vsyncadd [#allocation4], 4294967040 }
 0x1ac   :  { %346 = dma.done.wait [#allocation10], 512  }
 0x1ad   :  { %347 = vsyncadd [#allocation10], 4294966784 }
 0x1ae   :  { %182 = vsyncpa [#allocation3], 1 }
 0x1af   :  { %183 = vsyncpa [#allocation6], 1 }
 0x1b0   :  { %184 = vsyncpa [#allocation4], 1 }
 0x1b1   :  { %185 = vsyncpa [#allocation10], 1 }

</bundles_post_ra>
